<compile_context>
chip_gen: v6e
topology: v6e:2x2x1
jax: 0.10.0
libtpu: 0.0.40
codegen_flags: <defaults>
</compile_context>

<pallas_src>
import functools

import jax
import jax.numpy as jnp
from jax.experimental import pallas as pl
from jax.experimental.pallas import tpu as pltpu


def _projection_kernel(p_ref, w_ref, b_ref, o_ref):
    # p_ref: (TM, K) bf16 patch tile (pipelined); w_ref: (K, emb) bf16 weight.T
    # (resident); b_ref: (1, emb) f32 bias (resident); o_ref: (TM, emb) f32.
    acc = jnp.dot(p_ref[...], w_ref[...], preferred_element_type=jnp.float32)
    o_ref[...] = (acc + b_ref[...]).astype(o_ref.dtype)


def _round_up(x, m):
    return ((x + m - 1) // m) * m


def _choose_tm(m, k, emb, target_tm=512, budget_bytes=24 * 1024 * 1024):
    """Largest M-tile <= target that keeps the pipeline inside the VMEM budget."""
    tm = max(8, min(target_tm, _round_up(m, 8)))

    def vmem_bytes(t):
        # 2 buffers x (bf16 patch tile + f32 out tile) + resident weight + bias.
        return (2 * (t * k * 2 + t * emb * 4)
                + 2 * (k * emb * 2) + 2 * (emb * 4))

    while tm > 8 and vmem_bytes(tm) > budget_bytes:
        tm = max(8, _round_up(tm // 2, 8))
    return tm


@functools.partial(jax.jit, static_argnames=("patch_size",))
def patch_embedding_forward(x, weight, bias, *, patch_size):
    """x: (B, C, H, W) f32. weight: (emb, C*p*p) f32. bias: (emb,) f32.

    Returns (B, num_patches, emb) f32, matching
    nn.Linear(nn.Unfold(kernel_size=p, stride=p)(x).transpose(1, 2)).
    """
    B, C, H, W = x.shape
    p = patch_size
    assert H % p == 0 and W % p == 0, "H, W must be divisible by patch_size"
    nh, nw = H // p, W // p
    L = nh * nw
    K = C * p * p
    emb = weight.shape[0]

    # --- glue: unfold (patch extraction), matches torch.nn.Unfold ordering ---
    # (B, C, nh, p, nw, p) -> (B, nh, nw, C, p, p) -> (B*L, C*p*p). Per-patch
    # feature order is (c, kh, kw), identical to Unfold's C*p*p axis. Cast to
    # bf16 so the materialized patch matrix is half-width in HBM.
    patches = x.reshape(B, C, nh, p, nw, p)
    patches = jnp.transpose(patches, (0, 2, 4, 1, 3, 5))
    patches = patches.reshape(B * L, K).astype(jnp.bfloat16)

    w_t = weight.T.astype(jnp.bfloat16)      # (K, emb), resident in VMEM
    b2d = bias.reshape(1, emb)               # (1, emb), f32, resident

    M = B * L
    TM = _choose_tm(M, K, emb)
    M_pad = _round_up(M, TM)
    if M_pad != M:
        patches = jnp.pad(patches, ((0, M_pad - M), (0, 0)))
    grid_m = M_pad // TM

    cost = pl.CostEstimate(
        flops=2 * M * K * emb,
        transcendentals=0,
        bytes_accessed=M * K * 2 + K * emb * 2 + emb * 4 + M * emb * 4,
    )

    out = pl.pallas_call(
        _projection_kernel,
        out_shape=jax.ShapeDtypeStruct((M_pad, emb), jnp.float32),
        grid_spec=pltpu.PrefetchScalarGridSpec(
            num_scalar_prefetch=0,
            grid=(grid_m,),
            in_specs=[
                pl.BlockSpec((TM, K), lambda i: (i, 0)),    # patch tile (pipelined)
                pl.BlockSpec((K, emb), lambda i: (0, 0)),   # weight, resident
                pl.BlockSpec((1, emb), lambda i: (0, 0)),   # bias, resident
            ],
            out_specs=pl.BlockSpec((TM, emb), lambda i: (i, 0)),
        ),
        compiler_params=pltpu.CompilerParams(
            dimension_semantics=("parallel",),
            vmem_limit_bytes=32 * 1024 * 1024,
        ),
        cost_estimate=cost,
    )(patches, w_t, b2d)

    return out[:M].reshape(B, L, emb)


if __name__ == "__main__":
    # Module defaults: in_channels=3, patch_size=8, emb_size=128.
    B, C, H, W = 2, 3, 16, 16
    patch_size = 8
    emb_size = 128
    K = C * patch_size * patch_size

    key = jax.random.PRNGKey(0)
    kx, kw, kb = jax.random.split(key, 3)

    x = jax.random.normal(kx, (B, C, H, W), dtype=jnp.float32)
    # Deterministic synthetic "Linear" parameters.
    bound = 1.0 / (K ** 0.5)
    weight = jax.random.uniform(kw, (emb_size, K), minval=-bound, maxval=bound,
                                dtype=jnp.float32)
    bias = jax.random.uniform(kb, (emb_size,), minval=-bound, maxval=bound,
                              dtype=jnp.float32)

    out = patch_embedding_forward(x, weight, bias, patch_size=patch_size)
    out = jax.block_until_ready(out)

    # Reference: same unfold ordering + linear, with operands rounded to bf16
    # to match the kernel's MXU inputs (f32 accumulation in both).
    nh, nw = H // patch_size, W // patch_size
    ref_patches = jnp.transpose(
        x.reshape(B, C, nh, patch_size, nw, patch_size),
        (0, 2, 4, 1, 3, 5)).reshape(B, nh * nw, K)
    p_bf = ref_patches.astype(jnp.bfloat16).astype(jnp.float32)
    w_bf = weight.astype(jnp.bfloat16).astype(jnp.float32)
    ref = p_bf @ w_bf.T + bias

    assert out.shape == (B, nh * nw, emb_size)
    assert jnp.allclose(out, ref, atol=1e-3, rtol=1e-3), float(
        jnp.max(jnp.abs(out - ref)))

    print("KERNEL_OK")
</pallas_src>

<mosaic_0001>
module attributes {stable_mosaic.version = 11 : i64} {
  func.func @_projection_kernel(%arg0: i32, %arg1: memref<8x192xbf16, #tpu.memory_space<vmem>>, %arg2: memref<192x128xbf16, #tpu.memory_space<vmem>>, %arg3: memref<1x128xf32, #tpu.memory_space<vmem>>, %arg4: memref<8x128xf32, #tpu.memory_space<vmem>>) attributes {dimension_semantics = [#tpu.dimension_semantics<parallel>], iteration_bounds = array<i64: 1>, scalar_prefetch = 0 : i64, scratch_operands = 0 : i64, tpu.core_type = #tpu.core_type<tc>, window_params = [{transform_indices = @transform_0, window_bounds = array<i64: 8, 192>}, {pipeline_mode = #tpu.pipeline_mode<synchronous>, transform_indices = @transform_1, window_bounds = array<i64: 192, 128>}, {pipeline_mode = #tpu.pipeline_mode<synchronous>, transform_indices = @transform_2, window_bounds = array<i64: 1, 128>}, {transform_indices = @transform_3, window_bounds = array<i64: 8, 128>}]} {
    %c0 = arith.constant 0 : index
    %c0_0 = arith.constant 0 : index
    %0 = vector.load %arg1[%c0, %c0_0] : memref<8x192xbf16, #tpu.memory_space<vmem>>, vector<8x192xbf16>
    %c0_1 = arith.constant 0 : index
    %c0_2 = arith.constant 0 : index
    %1 = vector.load %arg2[%c0_1, %c0_2] : memref<192x128xbf16, #tpu.memory_space<vmem>>, vector<192x128xbf16>
    %cst = arith.constant dense<0.000000e+00> : vector<8x128xf32>
    %2 = tpu.matmul %0, %1, %cst {dimension_numbers = #tpu.dot_dimension_numbers<[1], [0], [0], [1], [0, 0, 1, 1], [], []>} : vector<8x192xbf16>, vector<192x128xbf16>, vector<8x128xf32> -> vector<8x128xf32>
    %c0_3 = arith.constant 0 : index
    %c0_4 = arith.constant 0 : index
    %3 = vector.load %arg3[%c0_3, %c0_4] : memref<1x128xf32, #tpu.memory_space<vmem>>, vector<1x128xf32>
    %4 = vector.broadcast %3 : vector<1x128xf32> to vector<8x128xf32>
    %5 = arith.addf %2, %4 : vector<8x128xf32>
    %c0_5 = arith.constant 0 : index
    %c0_6 = arith.constant 0 : index
    %6 = vector.load %arg4[%c0_5, %c0_6] : memref<8x128xf32, #tpu.memory_space<vmem>>, vector<8x128xf32>
    tpu.vector_store %arg4[%c0_5, %c0_6], %5 {strides = array<i32>} : memref<8x128xf32, #tpu.memory_space<vmem>>, vector<8x128xf32>,
    return
  }
  func.func @transform_0(%arg0: i32) -> (i32, i32) {
    %c0_i32 = arith.constant 0 : i32
    %c0_i32_0 = arith.constant 0 : i32
    return %arg0, %c0_i32 : i32, i32
  }
  func.func @transform_1(%arg0: i32) -> (i32, i32) {
    %c0_i32 = arith.constant 0 : i32
    %c0_i32_0 = arith.constant 0 : i32
    %c0_i32_1 = arith.constant 0 : i32
    return %c0_i32, %c0_i32_0 : i32, i32
  }
  func.func @transform_2(%arg0: i32) -> (i32, i32) {
    %c0_i32 = arith.constant 0 : i32
    %c0_i32_0 = arith.constant 0 : i32
    %c0_i32_1 = arith.constant 0 : i32
    return %c0_i32, %c0_i32_0 : i32, i32
  }
  func.func @transform_3(%arg0: i32) -> (i32, i32) {
    %c0_i32 = arith.constant 0 : i32
    %c0_i32_0 = arith.constant 0 : i32
    return %arg0, %c0_i32 : i32, i32
  }
}

</mosaic_0001>

<bundles_post_ra>
// kernel: patch_embedding_forward.1
= control target key start
LH: loop header
LB: loop body
LE: loop exit
PB: predicated region body
PF: predicated region fallthrough
CT: control target
= control target key end

     0   :  { %v239_v1 = vmov 0   ;;  %vm126_vm0 = vcmask 523264   ;;  %s306_s0 = inlined_call_operand.vmem [shape: bf16[8,192], index: 0, kind: input, shape index: {}]   ;;  %s307_s1 = inlined_call_operand.vmem [shape: bf16[192,128], index: 1, kind: input, shape index: {}]   ;;  %s308_s2 = inlined_call_operand.vmem [shape: f32[1,128], index: 2, kind: input, shape index: {}]   ;;  %s309_s3 = inlined_call_operand.hbm [shape: f32[8,128], index: 3, kind: output, shape index: {}]  }
   0x1   :  { %v203_v0 = vld [vmem:[%s307_s1 + $0x38] sm:$0xff]   ;;  %130 = vmatprep.subr.bf16.mxu0 %v239_v1  ;;  %v204_v2 = vld [vmem:[%s307_s1 + $0x30] sm:$0xff]   ;;  %v205_v3 = vld [vmem:[%s307_s1 + $0x28] sm:$0xff]  }
   0x2   :  { %131 = vmatpush1.bf16.msra.mxu0 %v203_v0  ;;  %v206_v4 = vld [vmem:[%s307_s1 + $0x20] sm:$0xff]  }
   0x3   :  { %132 = vmatprep.subr.bf16.mxu0 %v239_v1  ;;  %v16_v5 = vld [vmem:[%s306_s0] sm:$0xff] }
   0x6   :  { %133 = vmatpush1.bf16.msra.mxu0 %v204_v2 }
   0x7   :  { %134 = vmatprep.subr.bf16.mxu0 %v239_v1 }
   0xa   :  { %135 = vmatpush1.bf16.msra.mxu0 %v205_v3 }
   0xb   :  { %136 = vmatprep.subr.bf16.mxu0 %v239_v1 }
   0xc   :  { %8 = vsyncpa [#allocation3], 0  ;;  %v187_v6 = vcombine.high %v16_v5, %v16_v5  ;;  %v207_v7 = vld [vmem:[%s307_s1 + $0x18] sm:$0xff]   ;;  %v208_v8 = vld [vmem:[%s307_s1 + $0x10] sm:$0xff]   ;;  %v186_v15 = vcombine.low %v16_v5, %v16_v5  ;;  %s240_s12 = smov [#allocation2]  }
   0xd   :  { %v209_v9 = vld [vmem:[%s307_s1 + $0x8] sm:$0xff]   ;;  %v210_v10 = vld [vmem:[%s307_s1] sm:$0xff]   ;;  %v211_v11 = vld [vmem:[%s307_s1 + $0x58] sm:$0xff]   ;;  %s177_s13 = sshll.u32 %s240_s12, 4  ;;  %s178_s13 = int_to_ptr.vmem [resolvable:$true] %s177_s13 }
   0xe   :  { %137 = vmatpush1.bf16.msra.mxu0 %v206_v4  ;;  %200 = vmatprep.mubr.msk.bf16.mxu0 %vm126_vm0, %v187_v6  ;;  %v212_v12 = vld [vmem:[%s307_s1 + $0x50] sm:$0xff]   ;;  %v213_v13 = vld [vmem:[%s307_s1 + $0x48] sm:$0xff]   ;;  %v214_v14 = vld [vmem:[%s307_s1 + $0x40] sm:$0xff]   ;;  %s217_s14 = scalar_lea.vmem %s178_s13, 128  ;;  %p222_p1 = scmp.lt.s32.totalorder %s178_s13, %s178_s13 }
   0xf   :  { %138 = vmatprep.subr.bf16.mxu0 %v239_v1  ;;  %v185_v16 = vld [vmem:[%s308_s2] ss:$0 sm:$0xff]  ;;  %p218_p0 = scmp.ne.s32.totalorder %s178_s13, %s217_s14  ;;  %p223_p2 = scmp.lt.s32.totalorder %s217_s14, %s217_s14 }
  0x11   :  { %p224_p3 = por %p223_p2, %p222_p1 }
  0x12   :  { %139 = vmatpush1.bf16.msra.mxu0 %v207_v7 }
  0x13   :  { %140 = vmatprep.subr.bf16.mxu0 %v239_v1  ;;  %p225_p4 = pnand %p224_p3, %p218_p0 }
  0x16   :  { %141 = vmatpush1.bf16.msra.mxu0 %v208_v8 }
  0x17   :  { %142 = vmatprep.subr.bf16.mxu0 %v239_v1 }
  0x1a   :  { %143 = vmatpush1.bf16.msra.mxu0 %v209_v9 }
  0x1b   :  { %144 = vmatprep.subr.bf16.mxu0 %v239_v1 }
  0x1e   :  { %145 = vmatpush1.bf16.msra.mxu0 %v210_v10 }
  0x1f   :  { %154 = vmatprep.subr.bf16.mxu0 %v239_v1 }
  0x22   :  { %155 = vmatpush2.bf16.msra.mxu0 %v211_v11 }
  0x23   :  { %156 = vmatprep.subr.bf16.mxu0 %v239_v1 }
  0x26   :  { %157 = vmatpush2.bf16.msra.mxu0 %v212_v12 }
  0x27   :  { %158 = vmatprep.subr.bf16.mxu0 %v239_v1 }
  0x2a   :  { %159 = vmatpush2.bf16.msra.mxu0 %v213_v13 }
  0x2b   :  { %160 = vmatprep.subr.bf16.mxu0 %v239_v1 }
  0x2e   :  { %161 = vmatpush2.bf16.msra.mxu0 %v214_v14 }
  0x31   :  { %163 = vmatmul.mubr.bf16.vlgmr.msra.gmra.mxu0 %v186_v15 }
  0xf1   :  { %v164_v17 = vpop.f32.mrf.mxu0 }
  0xf2   :  { %v165_v18 = vadd.f32 %v185_v16, %v164_v17 }
  0xf3   :  { %v166_v19 = vpop.f32.mrf.mxu0 }
  0xf4   :  { %170 = vst [vmem:[#allocation2] sm:$0xff] %v165_v18 }
  0xf5   :  { %v167_v20 = vpop.f32.mrf.mxu0 }
  0xf6   :  { %228 = shalt.err (!%p225_p4)
}
  0xf7   :  { %180 = dma.vmem_to_hbm [thread:$0]  %s178_s13, 128, %s309_s3, [#allocation3]   ;;  %v168_v21 = vpop.f32.mrf.mxu0 }
  0xf8   :  { %237 = dma.done.wait [#allocation3], 128  }
  0xf9   :  { %238 = vsyncadd [#allocation3], 4294967168 }
  0xfa   :  { %184 = vsyncpa [#allocation3], 1 }

</bundles_post_ra>
